<compile_context>
chip_gen: v7x
topology: tpu7x:2x2x1
jax: 0.10.0
libtpu: 0.0.40
codegen_flags: <defaults>
</compile_context>

<pallas_src>
import functools

import jax
import jax.numpy as jnp
import numpy as np
from jax import lax
from jax.experimental import pallas as pl
from jax.experimental.pallas import tpu as pltpu

_VMEM = pltpu.MemorySpace.VMEM


# ---------------------------------------------------------------------------
# The single fused kernel (log_eta data path only).
# ---------------------------------------------------------------------------
def _fused_kernel(
    x_nodes_ref, dEv_ref, xcat_ref,
    batch_col_ref, batch_row_ref, src_col_ref, dst_row_ref,
    w1a_ref, w1b_ref, b1_ref,
    w2_ref, b2_ref,
    nw_ref, nb_ref,
    xwa_ref, xba_ref, xwn_ref, xbn_ref,
    out_ref):
  f32 = jnp.float32
  bf16 = jnp.bfloat16
  N = x_nodes_ref.shape[0]
  G = dEv_ref.shape[0]
  E = src_col_ref.shape[0]

  def mm(a, b):  # small / weight matmuls stay f32
    return jnp.dot(a, b, preferred_element_type=f32)

  # ---- one-hot structural matrices from integer index vectors (iota compares) ----
  # Big (N/E-sized) operands are built in bf16 (exact for 0/1) to feed the MXU;
  # graph-sized (G=2) one-hots stay f32 (trivial, avoids odd-shape bf16 tiles).
  Bmat = (lax.broadcasted_iota(jnp.int32, (N, G), 1)
          == batch_col_ref[...]).astype(f32)                        # [N, G]
  BmatT = (lax.broadcasted_iota(jnp.int32, (G, N), 0)
           == batch_row_ref[...]).astype(f32)                       # [G, N]
  S_src = (lax.broadcasted_iota(jnp.int32, (E, N), 1)
           == src_col_ref[...]).astype(bf16)                        # [E, N]
  S_dstT = (lax.broadcasted_iota(jnp.int32, (N, E), 0)
            == dst_row_ref[...]).astype(bf16)                       # [N, E]
  eyeN = (lax.broadcasted_iota(jnp.int32, (N, N), 0)
          == lax.broadcasted_iota(jnp.int32, (N, N), 1)).astype(f32)

  # ---- dense adjacency (A[dst, src] = 1) + GCN normalization ----
  A = jnp.minimum(jnp.dot(S_dstT, S_src, preferred_element_type=f32), 1.0)  # [N, N]
  A_hat = jnp.maximum(A, eyeN)                              # remaining self loops
  A_hat_bf = A_hat.astype(bf16)
  deg = jnp.sum(A_hat, axis=1, keepdims=True)               # [N, 1] in-degree (w/ self loop)
  d_is = lax.rsqrt(deg)                                     # deg^{-1/2}   (EUP)
  inv_deg = pl.reciprocal(deg, approx=True)                 # 1/deg        (EUP)
  scale_out = d_is * inv_deg                                 # deg^{-1/2}/deg  [N, 1]

  def gcn_prop(m):
    # D^{-1} D^{-1/2} A_hat D^{-1/2} m   -- GCNConv(gcn_norm) + aggr='mean';
    # only the MXU operands are downcast, VPU math stays f32.
    return jnp.dot(A_hat_bf, (m * d_is).astype(bf16),
                   preferred_element_type=f32) * scale_out

  # ---- conv1 on x = cat([x_nodes, x_cat[batch]]); W1 pre-split -> no concat ----
  m1 = mm(x_nodes_ref[...], w1a_ref[...]) + mm(Bmat, mm(xcat_ref[...], w1b_ref[...]))
  h1 = jnp.maximum(gcn_prop(m1) + b1_ref[...], 0.0)          # [N, H]

  # ---- convs[0] ----
  h2 = jnp.maximum(gcn_prop(mm(h1, w2_ref[...])) + b2_ref[...], 0.0)   # [N, H]

  # ---- readout: global mean pool with the ORIGINAL batch (JumpingKnowledge cat) ----
  counts = jnp.maximum(jnp.sum(BmatT, axis=1, keepdims=True), 1.0)     # [G, 1]
  xs0 = mm(BmatT, h2) * pl.reciprocal(counts, approx=True)             # [G, H]

  # ---- MLP + Eyring head (F.dropout(p=0.1) == identity at inference) ----
  y = jnp.maximum(mm(xs0, nw_ref[...]) + nb_ref[...], 0.0)             # relu(nnls[0])
  a0 = mm(y, xwa_ref[...]) + xba_ref[...]                              # [G, 1]
  n_exp = mm(y, xwn_ref[...]) + xbn_ref[...]                           # [G, 1] ('1 +' folded into bias)
  out_ref[...] = dEv_ref[...] * n_exp - a0                             # log_eta


# ---------------------------------------------------------------------------
# Wrapper: trace-time weight prep + a single pallas_call.
# ---------------------------------------------------------------------------
@functools.partial(jax.jit, static_argnums=(5,))
def eyring_edgepool_forward(params, x_in, x_nodes, edge_index, batch, num_graphs):
  N, F = x_nodes.shape
  G = num_graphs
  E = edge_index.shape[1]
  H = params['conv1_w'].shape[1]

  src = edge_index[0].astype(jnp.int32)
  dst = edge_index[1].astype(jnp.int32)
  batch = batch.astype(jnp.int32)

  dEv = x_in[:, 0:1]                      # torch.split(x_in, [1, 8], 1)
  x_cat = x_in[:, 1:9]

  # conv weights (split conv1 so the kernel never concatenates features)
  w1 = params['conv1_w']
  w1a, w1b = w1[:F], w1[F:]
  b1 = params['conv1_b'].reshape(1, -1)
  w2, b2 = params['convs'][0]             # only convs[0] feeds log_eta in this config

  nw, nb = params['nnls'][0]              # specialized: net_layers=2

  # linX split into the a0 / n columns; fold 'n = 1 + n' into the bias.
  xw, xb = params['linX_w'], params['linX_b']
  xwa, xwn = xw[:, 0:1], xw[:, 1:2]
  xba = xb[0].reshape(1, 1)
  xbn = (xb[1] + 1.0).reshape(1, 1)

  args = (
      x_nodes, dEv, x_cat,
      batch.reshape(N, 1), batch.reshape(1, N),
      src.reshape(E, 1), dst.reshape(1, E),
      w1a, w1b, b1,
      w2, b2.reshape(1, -1),
      nw, nb.reshape(1, -1),
      xwa, xba, xwn, xbn,
  )

  # Explicit VMEM budget (bytes) with generous headroom; keeps the kernel well
  # inside v7x's 32 MiB scoped default while still being explicit about intent.
  structural = 3 * N * N + 2 * E * N + 2 * N * G
  activations = N * (F + 8 + 4 * H) + G * (H + 64)
  scalars = 2 * E + 4 * N
  vmem_limit = int(min(64 << 20, max(8 << 20, 32 * 4 * (structural + activations + scalars))))

  log_eta = pl.pallas_call(
      _fused_kernel,
      out_shape=jax.ShapeDtypeStruct((G, 1), jnp.float32),
      in_specs=[pl.BlockSpec(memory_space=_VMEM)] * len(args),
      out_specs=pl.BlockSpec(memory_space=_VMEM),
      compiler_params=pltpu.CompilerParams(vmem_limit_bytes=vmem_limit),
  )(*args)
  return log_eta


# ---------------------------------------------------------------------------
# Plain-JAX reference of the output path (numerical sanity check).
# ---------------------------------------------------------------------------
def _reference_log_eta(params, x_in, x_nodes, edge_index, batch, num_graphs):
  src, dst = edge_index[0], edge_index[1]
  N = x_nodes.shape[0]
  dEv = x_in[:, 0:1]
  x_cat = x_in[:, 1:9]
  x = jnp.concatenate([x_nodes, x_cat[batch]], axis=1)
  A = jnp.zeros((N, N), jnp.float32).at[dst, src].set(1.0)
  A_hat = jnp.maximum(A, jnp.eye(N, dtype=jnp.float32))
  deg = A_hat.sum(axis=1, keepdims=True)
  d_is = 1.0 / jnp.sqrt(deg)
  P = A_hat * (d_is / deg) * d_is.T
  h = jax.nn.relu(P @ (x @ params['conv1_w']) + params['conv1_b'])
  w2, b2 = params['convs'][0]
  h = jax.nn.relu(P @ (h @ w2) + b2)
  onehot = jax.nn.one_hot(batch, num_graphs, dtype=jnp.float32)
  xs0 = (onehot.T @ h) / jnp.maximum(onehot.sum(axis=0)[:, None], 1.0)
  nw, nb = params['nnls'][0]
  y = jax.nn.relu(xs0 @ nw + nb)
  z = y @ params['linX_w'] + params['linX_b']
  return dEv * (1.0 + z[:, 1:2]) - z[:, 0:1]


# ---------------------------------------------------------------------------
# Deterministic parameter init (same layout as the PyTorch module).
# ---------------------------------------------------------------------------
def init_params(key, num_features=4, graph_layers=4, graph_hidden=32,
                net_layers=2, net_hidden=16):
  num_features += 8
  keys = iter(jax.random.split(key, 64))

  def lin_init(fan_in, fan_out):
    w = jax.random.normal(next(keys), (fan_in, fan_out), jnp.float32) / jnp.sqrt(
        jnp.float32(fan_in))
    b = jax.random.normal(next(keys), (fan_out,), jnp.float32) * 0.05
    return w, b

  params = {}
  params['conv1_w'], params['conv1_b'] = lin_init(num_features, graph_hidden)
  convs, pools = [], []
  p_len = 1  # default pooling: [global_mean_pool]
  for i in range(graph_layers - 1):
    convs.append(lin_init(graph_hidden, graph_hidden))
    if i % 2 == 0 and i < graph_layers - 2:
      w, b = lin_init(2 * graph_hidden, 1)   # EdgePooling.lin (unused on log_eta path)
      pools.append((w, b[0]))
  params['convs'] = convs
  params['pools'] = pools
  n_jump = len(pools) * graph_hidden * p_len
  nnhs = [n_jump] + [net_hidden] * (net_layers - 1)
  nnls = []
  for i in range(net_layers - 1):
    nnls.append(lin_init(nnhs[i], nnhs[i + 1]))
  params['nnls'] = nnls
  params['linX_w'], params['linX_b'] = lin_init(nnhs[-1], 2)
  return params


if __name__ == "__main__":
  key = jax.random.PRNGKey(0)
  k1, k2, kp = jax.random.split(key, 3)

  num_graphs = 2
  nodes_per_graph = 8
  N = num_graphs * nodes_per_graph
  num_features = 4

  x_in = jax.random.normal(k1, (num_graphs, 9), jnp.float32)   # [dEv | 8 graph feats]
  x_nodes = jax.random.normal(k2, (N, num_features), jnp.float32)
  batch = jnp.repeat(jnp.arange(num_graphs, dtype=jnp.int32), nodes_per_graph)

  # undirected ring per graph
  srcs, dsts = [], []
  for g in range(num_graphs):
    off = g * nodes_per_graph
    a = jnp.arange(nodes_per_graph, dtype=jnp.int32) + off
    b = (jnp.arange(nodes_per_graph, dtype=jnp.int32) + 1) % nodes_per_graph + off
    srcs += [a, b]
    dsts += [b, a]
  edge_index = jnp.stack([jnp.concatenate(srcs), jnp.concatenate(dsts)])

  params = init_params(kp, num_features=num_features)

  out = eyring_edgepool_forward(params, x_in, x_nodes, edge_index, batch, num_graphs)
  out = jax.block_until_ready(out)
  assert out.shape == (num_graphs, 1) and out.dtype == jnp.float32
  assert bool(jnp.all(jnp.isfinite(out)))

  ref = _reference_log_eta(params, x_in, x_nodes, edge_index, batch, num_graphs)
  # Tolerance covers bf16 MXU operands + approx reciprocals in the kernel.
  np.testing.assert_allclose(np.asarray(out), np.asarray(ref), rtol=5e-2, atol=5e-2)

  print("KERNEL_OK")
</pallas_src>

<mosaic_0001>
module attributes {stable_mosaic.version = 11 : i64} {
  func.func @_fused_kernel(%arg0: memref<16x4xf32, #tpu.memory_space<vmem>>, %arg1: memref<2x1xf32, #tpu.memory_space<vmem>>, %arg2: memref<2x8xf32, #tpu.memory_space<vmem>>, %arg3: memref<16x1xi32, #tpu.memory_space<vmem>>, %arg4: memref<1x16xi32, #tpu.memory_space<vmem>>, %arg5: memref<32x1xi32, #tpu.memory_space<vmem>>, %arg6: memref<1x32xi32, #tpu.memory_space<vmem>>, %arg7: memref<4x32xf32, #tpu.memory_space<vmem>>, %arg8: memref<8x32xf32, #tpu.memory_space<vmem>>, %arg9: memref<1x32xf32, #tpu.memory_space<vmem>>, %arg10: memref<32x32xf32, #tpu.memory_space<vmem>>, %arg11: memref<1x32xf32, #tpu.memory_space<vmem>>, %arg12: memref<32x16xf32, #tpu.memory_space<vmem>>, %arg13: memref<1x16xf32, #tpu.memory_space<vmem>>, %arg14: memref<16x1xf32, #tpu.memory_space<vmem>>, %arg15: memref<1x1xf32, #tpu.memory_space<vmem>>, %arg16: memref<16x1xf32, #tpu.memory_space<vmem>>, %arg17: memref<1x1xf32, #tpu.memory_space<vmem>>, %arg18: memref<2x1xf32, #tpu.memory_space<vmem>>) attributes {dimension_semantics = [], scalar_prefetch = 0 : i64, scratch_operands = 0 : i64, tpu.core_type = #tpu.core_type<tc>} {
    %0 = tpu.iota {dimensions = array<i32: 1>} : vector<16x2xi32>
    %c0 = arith.constant 0 : index
    %c0_0 = arith.constant 0 : index
    %1 = vector.load %arg3[%c0, %c0_0] : memref<16x1xi32, #tpu.memory_space<vmem>>, vector<16x1xi32>
    %2 = vector.broadcast %1 : vector<16x1xi32> to vector<16x2xi32>
    %3 = arith.cmpi eq, %0, %2 : vector<16x2xi32>
    %4 = arith.extui %3 : vector<16x2xi1> to vector<16x2xi32>
    %5 = arith.sitofp %4 : vector<16x2xi32> to vector<16x2xf32>
    %6 = tpu.iota {dimensions = array<i32: 0>} : vector<2x16xi32>
    %c0_1 = arith.constant 0 : index
    %c0_2 = arith.constant 0 : index
    %7 = vector.load %arg4[%c0_1, %c0_2] : memref<1x16xi32, #tpu.memory_space<vmem>>, vector<1x16xi32>
    %8 = vector.broadcast %7 : vector<1x16xi32> to vector<2x16xi32>
    %9 = arith.cmpi eq, %6, %8 : vector<2x16xi32>
    %10 = arith.extui %9 : vector<2x16xi1> to vector<2x16xi32>
    %11 = arith.sitofp %10 : vector<2x16xi32> to vector<2x16xf32>
    %12 = tpu.iota {dimensions = array<i32: 1>} : vector<32x16xi32>
    %c0_3 = arith.constant 0 : index
    %c0_4 = arith.constant 0 : index
    %13 = vector.load %arg5[%c0_3, %c0_4] : memref<32x1xi32, #tpu.memory_space<vmem>>, vector<32x1xi32>
    %14 = vector.broadcast %13 : vector<32x1xi32> to vector<32x16xi32>
    %15 = arith.cmpi eq, %12, %14 : vector<32x16xi32>
    %16 = arith.extui %15 : vector<32x16xi1> to vector<32x16xi32>
    %17 = arith.sitofp %16 : vector<32x16xi32> to vector<32x16xf32>
    %18 = arith.truncf %17 : vector<32x16xf32> to vector<32x16xbf16>
    %19 = tpu.iota {dimensions = array<i32: 0>} : vector<16x32xi32>
    %c0_5 = arith.constant 0 : index
    %c0_6 = arith.constant 0 : index
    %20 = vector.load %arg6[%c0_5, %c0_6] : memref<1x32xi32, #tpu.memory_space<vmem>>, vector<1x32xi32>
    %21 = vector.broadcast %20 : vector<1x32xi32> to vector<16x32xi32>
    %22 = arith.cmpi eq, %19, %21 : vector<16x32xi32>
    %23 = arith.extui %22 : vector<16x32xi1> to vector<16x32xi32>
    %24 = arith.sitofp %23 : vector<16x32xi32> to vector<16x32xf32>
    %25 = arith.truncf %24 : vector<16x32xf32> to vector<16x32xbf16>
    %26 = tpu.iota {dimensions = array<i32: 0>} : vector<16x16xi32>
    %27 = tpu.iota {dimensions = array<i32: 1>} : vector<16x16xi32>
    %28 = arith.cmpi eq, %26, %27 : vector<16x16xi32>
    %29 = arith.extui %28 : vector<16x16xi1> to vector<16x16xi32>
    %30 = arith.sitofp %29 : vector<16x16xi32> to vector<16x16xf32>
    %cst = arith.constant dense<0.000000e+00> : vector<16x16xf32>
    %31 = tpu.matmul %25, %18, %cst {dimension_numbers = #tpu.dot_dimension_numbers<[1], [0], [0], [1], [0, 0, 1, 1], [], []>} : vector<16x32xbf16>, vector<32x16xbf16>, vector<16x16xf32> -> vector<16x16xf32>
    %cst_7 = arith.constant 1.000000e+00 : f32
    %32 = vector.broadcast %cst_7 : f32 to vector<16x16xf32>
    %33 = arith.minimumf %31, %32 : vector<16x16xf32>
    %34 = arith.maximumf %33, %30 : vector<16x16xf32>
    %35 = arith.truncf %34 : vector<16x16xf32> to vector<16x16xbf16>
    %cst_8 = arith.constant dense<0.000000e+00> : vector<16xf32>
    %36 = vector.multi_reduction <add>, %34, %cst_8 [1] : vector<16x16xf32> to vector<16xf32>
    %37 = vector.shape_cast %36 : vector<16xf32> to vector<16x1xf32>
    %38 = math.rsqrt %37 : vector<16x1xf32>
    %39 = tpu.reciprocal %37 {approx = true} : vector<16x1xf32> -> vector<16x1xf32>
    %40 = arith.mulf %38, %39 : vector<16x1xf32>
    %c0_9 = arith.constant 0 : index
    %c0_10 = arith.constant 0 : index
    %41 = vector.load %arg0[%c0_9, %c0_10] : memref<16x4xf32, #tpu.memory_space<vmem>>, vector<16x4xf32>
    %c0_11 = arith.constant 0 : index
    %c0_12 = arith.constant 0 : index
    %42 = vector.load %arg7[%c0_11, %c0_12] : memref<4x32xf32, #tpu.memory_space<vmem>>, vector<4x32xf32>
    %cst_13 = arith.constant dense<0.000000e+00> : vector<16x32xf32>
    %43 = tpu.matmul %41, %42, %cst_13 {dimension_numbers = #tpu.dot_dimension_numbers<[1], [0], [0], [1], [0, 0, 1, 1], [], []>} : vector<16x4xf32>, vector<4x32xf32>, vector<16x32xf32> -> vector<16x32xf32>
    %c0_14 = arith.constant 0 : index
    %c0_15 = arith.constant 0 : index
    %44 = vector.load %arg2[%c0_14, %c0_15] : memref<2x8xf32, #tpu.memory_space<vmem>>, vector<2x8xf32>
    %c0_16 = arith.constant 0 : index
    %c0_17 = arith.constant 0 : index
    %45 = vector.load %arg8[%c0_16, %c0_17] : memref<8x32xf32, #tpu.memory_space<vmem>>, vector<8x32xf32>
    %cst_18 = arith.constant dense<0.000000e+00> : vector<2x32xf32>
    %46 = tpu.matmul %44, %45, %cst_18 {dimension_numbers = #tpu.dot_dimension_numbers<[1], [0], [0], [1], [0, 0, 1, 1], [], []>} : vector<2x8xf32>, vector<8x32xf32>, vector<2x32xf32> -> vector<2x32xf32>
    %cst_19 = arith.constant dense<0.000000e+00> : vector<16x32xf32>
    %47 = tpu.matmul %5, %46, %cst_19 {dimension_numbers = #tpu.dot_dimension_numbers<[1], [0], [0], [1], [0, 0, 1, 1], [], []>} : vector<16x2xf32>, vector<2x32xf32>, vector<16x32xf32> -> vector<16x32xf32>
    %48 = arith.addf %43, %47 : vector<16x32xf32>
    %49 = vector.broadcast %38 : vector<16x1xf32> to vector<16x32xf32>
    %50 = arith.mulf %48, %49 : vector<16x32xf32>
    %51 = arith.truncf %50 : vector<16x32xf32> to vector<16x32xbf16>
    %cst_20 = arith.constant dense<0.000000e+00> : vector<16x32xf32>
    %52 = tpu.matmul %35, %51, %cst_20 {dimension_numbers = #tpu.dot_dimension_numbers<[1], [0], [0], [1], [0, 0, 1, 1], [], []>} : vector<16x16xbf16>, vector<16x32xbf16>, vector<16x32xf32> -> vector<16x32xf32>
    %53 = vector.broadcast %40 : vector<16x1xf32> to vector<16x32xf32>
    %54 = arith.mulf %52, %53 : vector<16x32xf32>
    %c0_21 = arith.constant 0 : index
    %c0_22 = arith.constant 0 : index
    %55 = vector.load %arg9[%c0_21, %c0_22] : memref<1x32xf32, #tpu.memory_space<vmem>>, vector<1x32xf32>
    %56 = vector.broadcast %55 : vector<1x32xf32> to vector<16x32xf32>
    %57 = arith.addf %54, %56 : vector<16x32xf32>
    %cst_23 = arith.constant 0.000000e+00 : f32
    %58 = vector.broadcast %cst_23 : f32 to vector<16x32xf32>
    %59 = arith.maximumf %57, %58 : vector<16x32xf32>
    %c0_24 = arith.constant 0 : index
    %c0_25 = arith.constant 0 : index
    %60 = vector.load %arg10[%c0_24, %c0_25] : memref<32x32xf32, #tpu.memory_space<vmem>>, vector<32x32xf32>
    %cst_26 = arith.constant dense<0.000000e+00> : vector<16x32xf32>
    %61 = tpu.matmul %59, %60, %cst_26 {dimension_numbers = #tpu.dot_dimension_numbers<[1], [0], [0], [1], [0, 0, 1, 1], [], []>} : vector<16x32xf32>, vector<32x32xf32>, vector<16x32xf32> -> vector<16x32xf32>
    %62 = vector.broadcast %38 : vector<16x1xf32> to vector<16x32xf32>
    %63 = arith.mulf %61, %62 : vector<16x32xf32>
    %64 = arith.truncf %63 : vector<16x32xf32> to vector<16x32xbf16>
    %cst_27 = arith.constant dense<0.000000e+00> : vector<16x32xf32>
    %65 = tpu.matmul %35, %64, %cst_27 {dimension_numbers = #tpu.dot_dimension_numbers<[1], [0], [0], [1], [0, 0, 1, 1], [], []>} : vector<16x16xbf16>, vector<16x32xbf16>, vector<16x32xf32> -> vector<16x32xf32>
    %66 = vector.broadcast %40 : vector<16x1xf32> to vector<16x32xf32>
    %67 = arith.mulf %65, %66 : vector<16x32xf32>
    %c0_28 = arith.constant 0 : index
    %c0_29 = arith.constant 0 : index
    %68 = vector.load %arg11[%c0_28, %c0_29] : memref<1x32xf32, #tpu.memory_space<vmem>>, vector<1x32xf32>
    %69 = vector.broadcast %68 : vector<1x32xf32> to vector<16x32xf32>
    %70 = arith.addf %67, %69 : vector<16x32xf32>
    %cst_30 = arith.constant 0.000000e+00 : f32
    %71 = vector.broadcast %cst_30 : f32 to vector<16x32xf32>
    %72 = arith.maximumf %70, %71 : vector<16x32xf32>
    %cst_31 = arith.constant dense<0.000000e+00> : vector<2xf32>
    %73 = vector.multi_reduction <add>, %11, %cst_31 [1] : vector<2x16xf32> to vector<2xf32>
    %74 = vector.shape_cast %73 : vector<2xf32> to vector<2x1xf32>
    %cst_32 = arith.constant 1.000000e+00 : f32
    %75 = vector.broadcast %cst_32 : f32 to vector<2x1xf32>
    %76 = arith.maximumf %74, %75 : vector<2x1xf32>
    %cst_33 = arith.constant dense<0.000000e+00> : vector<2x32xf32>
    %77 = tpu.matmul %11, %72, %cst_33 {dimension_numbers = #tpu.dot_dimension_numbers<[1], [0], [0], [1], [0, 0, 1, 1], [], []>} : vector<2x16xf32>, vector<16x32xf32>, vector<2x32xf32> -> vector<2x32xf32>
    %78 = tpu.reciprocal %76 {approx = true} : vector<2x1xf32> -> vector<2x1xf32>
    %79 = vector.broadcast %78 : vector<2x1xf32> to vector<2x32xf32>
    %80 = arith.mulf %77, %79 : vector<2x32xf32>
    %c0_34 = arith.constant 0 : index
    %c0_35 = arith.constant 0 : index
    %81 = vector.load %arg12[%c0_34, %c0_35] : memref<32x16xf32, #tpu.memory_space<vmem>>, vector<32x16xf32>
    %cst_36 = arith.constant dense<0.000000e+00> : vector<2x16xf32>
    %82 = tpu.matmul %80, %81, %cst_36 {dimension_numbers = #tpu.dot_dimension_numbers<[1], [0], [0], [1], [0, 0, 1, 1], [], []>} : vector<2x32xf32>, vector<32x16xf32>, vector<2x16xf32> -> vector<2x16xf32>
    %c0_37 = arith.constant 0 : index
    %c0_38 = arith.constant 0 : index
    %83 = vector.load %arg13[%c0_37, %c0_38] : memref<1x16xf32, #tpu.memory_space<vmem>>, vector<1x16xf32>
    %84 = vector.broadcast %83 : vector<1x16xf32> to vector<2x16xf32>
    %85 = arith.addf %82, %84 : vector<2x16xf32>
    %cst_39 = arith.constant 0.000000e+00 : f32
    %86 = vector.broadcast %cst_39 : f32 to vector<2x16xf32>
    %87 = arith.maximumf %85, %86 : vector<2x16xf32>
    %c0_40 = arith.constant 0 : index
    %c0_41 = arith.constant 0 : index
    %88 = vector.load %arg14[%c0_40, %c0_41] : memref<16x1xf32, #tpu.memory_space<vmem>>, vector<16x1xf32>
    %cst_42 = arith.constant dense<0.000000e+00> : vector<2x1xf32>
    %89 = tpu.matmul %87, %88, %cst_42 {dimension_numbers = #tpu.dot_dimension_numbers<[1], [0], [0], [1], [0, 0, 1, 1], [], []>} : vector<2x16xf32>, vector<16x1xf32>, vector<2x1xf32> -> vector<2x1xf32>
    %c0_43 = arith.constant 0 : index
    %c0_44 = arith.constant 0 : index
    %90 = vector.load %arg15[%c0_43, %c0_44] : memref<1x1xf32, #tpu.memory_space<vmem>>, vector<1x1xf32>
    %91 = vector.broadcast %90 : vector<1x1xf32> to vector<2x1xf32>
    %92 = arith.addf %89, %91 : vector<2x1xf32>
    %c0_45 = arith.constant 0 : index
    %c0_46 = arith.constant 0 : index
    %93 = vector.load %arg16[%c0_45, %c0_46] : memref<16x1xf32, #tpu.memory_space<vmem>>, vector<16x1xf32>
    %cst_47 = arith.constant dense<0.000000e+00> : vector<2x1xf32>
    %94 = tpu.matmul %87, %93, %cst_47 {dimension_numbers = #tpu.dot_dimension_numbers<[1], [0], [0], [1], [0, 0, 1, 1], [], []>} : vector<2x16xf32>, vector<16x1xf32>, vector<2x1xf32> -> vector<2x1xf32>
    %c0_48 = arith.constant 0 : index
    %c0_49 = arith.constant 0 : index
    %95 = vector.load %arg17[%c0_48, %c0_49] : memref<1x1xf32, #tpu.memory_space<vmem>>, vector<1x1xf32>
    %96 = vector.broadcast %95 : vector<1x1xf32> to vector<2x1xf32>
    %97 = arith.addf %94, %96 : vector<2x1xf32>
    %c0_50 = arith.constant 0 : index
    %c0_51 = arith.constant 0 : index
    %98 = vector.load %arg1[%c0_50, %c0_51] : memref<2x1xf32, #tpu.memory_space<vmem>>, vector<2x1xf32>
    %99 = arith.mulf %98, %97 : vector<2x1xf32>
    %100 = arith.subf %99, %92 : vector<2x1xf32>
    %c0_52 = arith.constant 0 : index
    %c0_53 = arith.constant 0 : index
    %101 = vector.load %arg18[%c0_52, %c0_53] : memref<2x1xf32, #tpu.memory_space<vmem>>, vector<2x1xf32>
    tpu.vector_store %arg18[%c0_52, %c0_53], %100 {strides = array<i32>} : memref<2x1xf32, #tpu.memory_space<vmem>>, vector<2x1xf32>,
    return
  }
}

</mosaic_0001>

<bundles_post_ra>
// kernel: eyring_edgepool_forward.1
= control target key start
LH: loop header
LB: loop body
LE: loop exit
PB: predicated region body
PF: predicated region fallthrough
CT: control target
= control target key end

     0   :  { %v1183_v0 = vmov 0.0   ;;  %v1184_v1 = vmov 0   ;;  %vm207_vm0 = vcmask 64512   ;;  %vm1185_vm1 = vmmov 0   ;;  %s1426_s8 = inlined_call_operand.vmem [shape: f32[8,32], index: 8, kind: input, shape index: {}]   ;;  %s1427_s5 = inlined_call_operand.vmem [shape: s32[32,1], index: 5, kind: input, shape index: {}]   ;;  %s1428_s2 = inlined_call_operand.vmem [shape: f32[2,8], index: 2, kind: input, shape index: {}]   ;;  %s1429_s3 = inlined_call_operand.vmem [shape: s32[16,1], index: 3, kind: input, shape index: {}]   ;;  %s1430_s6 = inlined_call_operand.vmem [shape: s32[1,32], index: 6, kind: input, shape index: {}]   ;;  %s1431_s7 = inlined_call_operand.vmem [shape: f32[4,32], index: 7, kind: input, shape index: {}]   ;;  %s1432_s0 = inlined_call_operand.vmem [shape: f32[16,4], index: 0, kind: input, shape index: {}]   ;;  %s1433_s10 = inlined_call_operand.vmem [shape: f32[32,32], index: 10, kind: input, shape index: {}]   ;;  %s1434_s9 = inlined_call_operand.vmem [shape: f32[1,32], index: 9, kind: input, shape index: {}]   ;;  %s1435_s4 = inlined_call_operand.vmem [shape: s32[1,16], index: 4, kind: input, shape index: {}]   ;;  %s1436_s12 = inlined_call_operand.vmem [shape: f32[32,16], index: 12, kind: input, shape index: {}]   ;;  %s1437_s11 = inlined_call_operand.vmem [shape: f32[1,32], index: 11, kind: input, shape index: {}]   ;;  %s1438_s14 = inlined_call_operand.vmem [shape: f32[16,1], index: 14, kind: input, shape index: {}]   ;;  %s1439_s15 = inlined_call_operand.<no memory space> [shape: f32[1,1], index: 15, kind: input, shape index: {}]   ;;  %s1440_s13 = inlined_call_operand.vmem [shape: f32[1,16], index: 13, kind: input, shape index: {}]   ;;  %s1441_s16 = inlined_call_operand.vmem [shape: f32[16,1], index: 16, kind: input, shape index: {}]   ;;  %s1442_s17 = inlined_call_operand.<no memory space> [shape: f32[1,1], index: 17, kind: input, shape index: {}]   ;;  %s1443_s1 = inlined_call_operand.vmem [shape: f32[2,1], index: 1, kind: input, shape index: {}]   ;;  %s1444_s18 = inlined_call_operand.vmem [shape: f32[2,1], index: 18, kind: output, shape index: {}]  }
   0x1   :  { %1446 = sst [smem:[#allocation4_spill]] %s1426_s8  ;;  %1071 = vmatprep.subr.mxu1 %v1183_v0  ;;  %1172 = vset.pattern.permute.xlu1 %v1184_v1  ;;  %v67_v8 = vld [vmem:[%s1429_s3 + $0x8] sm:$0xff]  ;;  %v66_v9 = vld [vmem:[%s1429_s3] sm:$0xff]  ;;  %v64_v10 = vlaneseq  ;;  %v1186_v19 = vmov 1.0|1.0   ;;  %vm281_vm9 = vcmask 15360  }
   0x2   :  { %1447 = sst [smem:[#allocation5_spill]] %s1427_s5  ;;  %s1449_s29 = sld [smem:[#allocation4_spill]]  ;;  %1171 = vset.pattern.permute.xlu0 %v1184_v1  ;;  %1073 = vmatprep.mubr.msk.f32.mxu1 %vm1185_vm1, %v1183_v0  ;;  %v998_v16 = vld [vmem:[%s1430_s6] ss:$0 sm:$0xff]  ;;  %vm139_vm12 = vcmask 261120   ;;  %vm288_vm13 = vcmask 1041408  }
   0x3   :  { %1448 = sst [smem:[#allocation6_spill]] %s1428_s2  ;;  %s1450_s19 = sld [smem:[#allocation5_spill]]  ;;  %1063 = vmatprep.subr.bf16.mxu0 %v1183_v0  ;;  %1067 = vmatprep.mubr.msk.bf16.mxu0 %vm1185_vm1, %v1183_v0  ;;  %v1313_v11 = vshrl.u32 %v64_v10, 7  ;;  %v65_v15 = vand.u32 127, %v64_v10  ;;  %v204_v27 = vld [vmem:[%s1431_s7] sm:$0xf] }
   0x4   :  { %s1451_s2 = sld [smem:[#allocation6_spill]]  ;;  %vm374_vm15 = vcmask 1043456   ;;  %v202_v28 = vld [vmem:[%s1432_s0] sm:$0xff]  ;;  %v203_v31 = vld [vmem:[%s1432_s0 + $0x8] sm:$0xff]  ;;  %v515_v57 = vld [vmem:[%s1433_s10 + $0x10] sm:$0xff] }
   0x5   :  { %v120_v14 = vadd.s32 8, %v1313_v11  ;;  %vm126_vm2 = vcmp.eq.s32.totalorder %v1313_v11, %v998_v16  ;;  %v513_v54 = vld [vmem:[%s1433_s10] sm:$0xff]  ;;  %v514_v55 = vld [vmem:[%s1433_s10 + $0x8] sm:$0xff]  ;;  %v516_v58 = vld [vmem:[%s1433_s10 + $0x18] sm:$0xff] }
   0x6   :  { %v999_v20 = vsel %vm126_vm2, 1.0, %v1183_v0  ;;  %vm133_vm2 = vcmp.eq.s32.totalorder %v1313_v11, %v65_v15  ;;  %v1141_v56 = vpack.c.bf16 %v514_v55, %v513_v54  ;;  %v1145_v59 = vpack.c.bf16 %v516_v58, %v515_v57  ;;  %v1016_v1 = vld [vmem:[%s1434_s9] ss:$0 sm:$0xff] }
   0x7   :  { %vm127_vm3 = vcmp.eq.s32.totalorder %v120_v14, %v998_v16  ;;  %v1001_v33 = vsel %vm133_vm2, 1.0, %v1183_v0  ;;  %v25_v57 = vstv %s1442_s17 }
   0x8   :  { %v206_v2 = vld [vmem:[%s1449_s29] sm:$0xff]  ;;  %v1000_v21 = vsel %vm127_vm3, 1.0, %v1183_v0  ;;  %vm134_vm3 = vcmp.eq.s32.totalorder %v120_v14, %v65_v15  ;;  %26 = vst [vmem:[#allocation3] sm:$0x1] %v25_v57 }
   0x9   :  { %v92_v3 = vld [vmem:[%s1450_s19 + $0x10] sm:$0xff]  ;;  %v90_v4 = vld [vmem:[%s1450_s19] sm:$0xff]  ;;  %1072 = vmatpush3.msra.mxu1 %v206_v2  ;;  %v93_v6 = vld [vmem:[%s1450_s19 + $0x18] sm:$0xff]  ;;  %v132_v24 = vpack.c.bf16 %v1000_v21, %v999_v20  ;;  %v1002_v37 = vsel %vm134_vm3, 1.0, %v1183_v0 }
   0xa   :  { %v205_v5 = vld [vmem:[%s1451_s2] sm:$0x3]  ;;  %101 = vperm.xlu1 %1172, %v92_v3   ;;  %95 = vperm.xlu0 %1171, %v90_v4   ;;  %v91_v7 = vld [vmem:[%s1450_s19 + $0x8] sm:$0xff] }
   0xb   :  { %1074 = vmatmul.mubr.msk.f32.vlgmr.msra.gmra.mrb[0].mxu1 %vm207_vm0, %v205_v5  ;;  %vm367_vm0 = vcmask 31744  }
   0xe   :  { %104 = vperm.xlu1 %1172, %v93_v6   ;;  %98 = vperm.xlu0 %1171, %v91_v7  }
  0x12   :  { %72 = vperm.xlu1 %1172, %v67_v8   ;;  %69 = vperm.xlu0 %1171, %v66_v9  }
  0x89   :  { %v102_v12 = vpop.permute.xlu1 %101  ;;  %v96_v13 = vpop.permute.xlu0 %95 }
  0x8a   :  { %vm106_vm4 = vcmp.eq.s32.totalorder %v65_v15, %v96_v13  ;;  %vm108_vm7 = vcmp.eq.s32.totalorder %v65_v15, %v102_v12 }
  0x8d   :  { %v105_v17 = vpop.permute.xlu1 %104  ;;  %v99_v18 = vpop.permute.xlu0 %98 }
  0x8e   :  { %vm107_vm5 = vcmp.eq.s32.totalorder %v65_v15, %v99_v18  ;;  %vm109_vm8 = vcmp.eq.s32.totalorder %v65_v15, %v105_v17  ;;  %v1187_v18 = vmov 0.0|0.0  }
  0x8f   :  { %vm1003_vm6 = vmpackc.low %vm107_vm5, %vm106_vm4  ;;  %vm189_vm4 = vcmask 130048  }
  0x90   :  { %1064 = vmatpush3.bf16.msk.msra.mxu0 %vm1003_vm6, %v1186_v19  ;;  %vm1005_vm11 = vmpackc.low %vm109_vm8, %vm108_vm7  ;;  %vm655_vm6 = vcmask 123904  }
  0x91   :  { %v70_v22 = vpop.permute.xlu0 %69  ;;  %1065 = vmatprep.subr.bf16.mxu0 %v1183_v0  ;;  %v73_v25 = vpop.permute.xlu1 %72 }
  0x92   :  { %vm74_vm10 = vcmp.eq.s32.totalorder %v65_v15, %v70_v22  ;;  %vm75_vm14 = vcmp.eq.s32.totalorder %v65_v15, %v73_v25  ;;  %v735_v22 = vld [vmem:[%s1436_s12] sm:$0xff] }
  0x93   :  { %v990_v23 = vsel %vm74_vm10, 1.0, %v1183_v0  ;;  %v991_v30 = vsel %vm75_vm14, 1.0, %v1183_v0 }
  0x94   :  { %1066 = vmatpush3.bf16.msk.msra.mxu0 %vm1005_vm11, %v1186_v19  ;;  %1078 = vmatprep.mubr.msk.f32.mxu1 %vm281_vm9, %v990_v23  ;;  %v992_v19 = vld [vmem:[%s1435_s4] ss:$0 sm:$0xff]  ;;  %v736_v23 = vld [vmem:[%s1436_s12 + $0x8] sm:$0xff] }
  0x95   :  { %1142 = vmatprep.subr.bf16.mxu0 %v1141_v56  ;;  %vm87_vm5 = vcmp.eq.s32.totalorder %v1313_v11, %v992_v19  ;;  %v1020_v11 = vld [vmem:[%s1437_s11] ss:$0 sm:$0xff] }
  0x96   :  { %v993_v20 = vsel %vm87_vm5, 1.0, %v1183_v0 }
  0x97   :  { %1068 = vmatmul.mubr.msk.bf16.vlgmr.msra.gmra.mrb[0].mxu0 %vm139_vm12, %v132_v24  ;;  %v656_v21 = vsel %vm655_vm6, %v993_v20, 0.0  ;;  %v1153_v24 = vpack.c.bf16 %v736_v23, %v735_v22 }
  0x98   :  { %1144 = vmatpush3.bf16.msra.mxu0 %v1141_v56 }
  0x99   :  { %1146 = vmatprep.subr.bf16.mxu0 %v1145_v59 }
  0x9c   :  { %1148 = vmatpush3.bf16.msra.mxu0 %v1145_v59 }
  0x9d   :  { %1103 = vmatprep.subr.bf16.mxu0 %v1183_v0 }
  0xde   :  { %v277_v26 = vpop.f32.mrb[0].mxu1 }
  0xdf   :  { %1076 = vmatprep.subr.msk.mxu1 %vm288_vm13, %v277_v26  ;;  %v1075_v29 = vpop.f32.mrb[1].mxu1 }
  0xe0   :  { %1077 = vmatpush3.msk.msra.mxu1 %vm288_vm13, %v277_v26 }
  0xe1   :  { %1079 = vmatmul.mubr.msk.f32.vlgmr.msra.gmra.mrb[2].mxu1 %vm281_vm9, %v991_v30  ;;  %1081 = vmatprep.subr.msk.mxu1 %vm374_vm15, %v204_v27 }
  0xe2   :  { %1082 = vmatpush3.msk.msra.mxu1 %vm374_vm15, %v204_v27  ;;  %1083 = vmatprep.mubr.msk.f32.mxu1 %vm367_vm0, %v202_v28 }
  0xe3   :  { %1086 = vmatprep.subr.bf16.mxu1 %v1183_v0 }
  0xe9   :  { %1084 = vmatmul.mubr.msk.f32.vlgmr.msra.gmra.mrb[2].mxu1 %vm367_vm0, %v203_v31 }
  0xea   :  { %1088 = vmatprep.mubr.msk.bf16.mxu1 %vm1185_vm1, %v1183_v0 }
 0x16a   :  { %v177_v32 = vpop.f32.mrb[0].mxu0 }
 0x16b   :  { %v184_v34 = vmin.f32 %v177_v32, 1.0  ;;  %v1069_v35 = vpop.f32.mrb[1].mxu0 }
 0x16c   :  { %v180_v36 = vpop.f32.mrb[2].mxu0 }
 0x16d   :  { %v185_v38 = vmin.f32 %v180_v36, 1.0  ;;  %v1070_v39 = vpop.f32.mrb[3].mxu0  ;;  %v186_v40 = vmax.f32 %v184_v34, %v1001_v33  ;;  %v737_v36 = vld [vmem:[%s1436_s12 + $0x10] sm:$0xff] }
 0x16f   :  { %v190_v41 = vsel %vm189_vm4, %v186_v40, 0.0  ;;  %v187_v42 = vmax.f32 %v185_v38, %v1002_v37  ;;  %v738_v37 = vld [vmem:[%s1436_s12 + $0x18] sm:$0xff] }
 0x170   :  { %191 = vadd.xlane.f32.xlu0 %v190_v41  ;;  %v1156_v38 = vpack.c.bf16 %v738_v37, %v737_v36 }
 0x171   :  { %v188_v43 = vpack.c.bf16 %v187_v42, %v186_v40  ;;  %v193_v44 = vsel %vm189_vm4, %v187_v42, 0.0 }
 0x172   :  { %194 = vadd.xlane.f32.xlu1 %v193_v44 }
 0x174   :  { %657 = vadd.xlane.f32.xlu0 %v656_v21 }
 0x1bc   :  { %v1085_v45 = vpop.f32.mrb[2].mxu1 }
 0x1bd   :  { %v444_v46 = vpop.f32.mrb[3].mxu1 }
 0x1fd   :  { %v192_v47 = vpop.xlane.xlu0 %191 }
 0x1fe   :  { %1173 = vrsqrt.f32 %v192_v47 }
 0x1ff   :  { %v195_v48 = vpop.xlane.xlu1 %194 }
 0x200   :  { %1175 = vrsqrt.f32 %v195_v48 }
 0x201   :  { %1177 = vrcp.f32 %v192_v47  ;;  %v658_v39 = vpop.xlane.xlu0 %657 }
 0x202   :  { %1179 = vrcp.f32 %v195_v48  ;;  %v659_v40 = vmax.f32 %v658_v39, 1.0  ;;  %v23_v48 = vstv %s1439_s15 }
 0x203   :  { %24 = vst [vmem:[#allocation2] sm:$0x1] %v23_v48 }
 0x204   :  { %1181 = vrcp.f32 %v659_v40 }
 0x208   :  { %v1174_v49 = vpop.eup %1173 }
 0x209   :  { %v453_v51 = vmul.f32 %v1174_v49, %v444_v46  ;;  %v821_v46 = vld [vmem:[%s1438_s14 + $0x8] sm:$0xff] }
 0x20a   :  { %v1176_v50 = vpop.eup %1175 }
 0x20b   :  { %v454_v52 = vmul.f32 %v1176_v50, %v1085_v45  ;;  %v1178_v60 = vpop.eup %1177  ;;  %v820_v45 = vld [vmem:[%s1438_s14] sm:$0xff] }
 0x20c   :  { %v1180_v61 = vpop.eup %1179  ;;  %v200_v62 = vmul.f32 %v1178_v60, %v1174_v49  ;;  %v1159_v47 = vpack.c.bf16 %v821_v46, %v820_v45  ;;  %v1026_v60 = vld [vmem:[#allocation3] ss:$0 sm:$0xff] }
 0x20d   :  { %v455_v53 = vpack.c.bf16 %v454_v52, %v453_v51  ;;  %v201_v4 = vmul.f32 %v1180_v61, %v1176_v50  ;;  %v903_v51 = vld [vmem:[%s1441_s16 + $0x8] sm:$0xff]  ;;  %v1024_v61 = vld [vmem:[#allocation2] ss:$0 sm:$0xff] }
 0x20e   :  { %v1182_v41 = vpop.eup %1181 }
 0x20f   :  { %1087 = vmatpush3.bf16.msra.mxu1 %v455_v53 }
 0x210   :  { %1149 = vmatprep.subr.bf16.mxu1 %v1187_v18 }
 0x212   :  { %1089 = vmatmul.mubr.msk.bf16.vlgmr.msra.gmra.mrb[4].mxu1 %vm189_vm4, %v188_v43 }
 0x213   :  { %1113 = vmatprep.mubr.msk.f32.mxu1 %vm1185_vm1, %v1183_v0 }
 0x2e5   :  { %v493_v63 = vpop.f32.mrb[4].mxu1 }
 0x2e6   :  { %v500_v2 = vmul.f32 %v493_v63, %v200_v62  ;;  %v1090_v3 = vpop.f32.mrb[5].mxu1  ;;  %v981_v63 = vld [vmem:[%s1443_s1] sm:$0x3] }
 0x2e7   :  { %v496_v5 = vpop.f32.mrb[6].mxu1 }
 0x2e8   :  { %v509_v6 = vadd.f32 %v1016_v1, %v500_v2  ;;  %v501_v7 = vmul.f32 %v496_v5, %v201_v4  ;;  %v1091_v8 = vpop.f32.mrb[7].mxu1 }
 0x2ea   :  { %v511_v9 = vmax.f32 %v509_v6, 0.0  ;;  %v510_v10 = vadd.f32 %v1016_v1, %v501_v7 }
 0x2ec   :  { %v512_v12 = vmax.f32 %v510_v10, 0.0  ;;  %1100 = vmatprep.mubr.msk.f32.mxu0 %vm139_vm12, %v511_v9 }
 0x2ee   :  { %1101 = vmatmul.mubr.msk.f32.vlgmr.msra.gmra.mrb[4].mxu0 %vm139_vm12, %v512_v12 }
 0x2ef   :  { %1105 = vmatprep.mubr.msk.bf16.mxu0 %vm1185_vm1, %v1183_v0 }
 0x3c1   :  { %v1102_v13 = vpop.f32.mrb[4].mxu0 }
 0x3c2   :  { %v599_v14 = vmul.f32 %v1176_v50, %v1102_v13  ;;  %v589_v15 = vpop.f32.mrb[5].mxu0  ;;  %v902_v50 = vld [vmem:[%s1441_s16] sm:$0xff] }
 0x3c3   :  { %v598_v16 = vmul.f32 %v1174_v49, %v589_v15  ;;  %v1022_v49 = vld [vmem:[%s1440_s13] ss:$0 sm:$0xff]  ;;  %v1162_v55 = vpack.c.bf16 %v903_v51, %v902_v50 }
 0x3c5   :  { %v600_v17 = vpack.c.bf16 %v599_v14, %v598_v16 }
 0x3c7   :  { %1104 = vmatpush3.bf16.msra.mxu0 %v600_v17 }
 0x3c8   :  { %1152 = vmatprep.subr.bf16.mxu0 %v1187_v18 }
 0x3ca   :  { %1106 = vmatmul.mubr.msk.bf16.vlgmr.msra.gmra.mrb[8].mxu0 %vm189_vm4, %v188_v43 }
 0x3cb   :  { %1124 = vmatprep.mubr.msk.f32.mxu0 %vm1185_vm1, %v1183_v0  ;;  %1154 = vmatpush3.bf16.msra.mxu0 %v1153_v24 }
 0x3cc   :  { %1155 = vmatprep.subr.bf16.mxu0 %v1187_v18 }
 0x3cf   :  { %1157 = vmatpush3.bf16.msra.mxu0 %v1156_v38 }
 0x49d   :  { %v635_v25 = vpop.f32.mrb[8].mxu0 }
 0x49e   :  { %v642_v26 = vmul.f32 %v635_v25, %v200_v62  ;;  %v1107_v27 = vpop.f32.mrb[9].mxu0 }
 0x49f   :  { %v638_v28 = vpop.f32.mrb[10].mxu0 }
 0x4a0   :  { %v651_v29 = vadd.f32 %v1020_v11, %v642_v26  ;;  %v643_v30 = vmul.f32 %v638_v28, %v201_v4  ;;  %v1108_v31 = vpop.f32.mrb[11].mxu0 }
 0x4a2   :  { %v652_v32 = vadd.f32 %v1020_v11, %v643_v30  ;;  %v653_v33 = vmax.f32 %v651_v29, 0.0 }
 0x4a4   :  { %v654_v34 = vmax.f32 %v652_v32, 0.0 }
 0x4a6   :  { %v1150_v35 = vpack.c.bf16 %v654_v34, %v653_v33 }
 0x4a8   :  { %1151 = vmatpush3.bf16.msra.mxu1 %v1150_v35 }
 0x4a9   :  { %1158 = vmatprep.subr.bf16.mxu1 %v1187_v18 }
 0x4ab   :  { %1114 = vmatmul.mubr.msk.f32.vlgmr.msra.gmra.mrb[8].mxu1 %vm189_vm4, %v993_v20 }
 0x4ac   :  { %1131 = vmatprep.mubr.msk.f32.mxu1 %vm1185_vm1, %v1183_v0  ;;  %1160 = vmatpush3.bf16.msra.mxu1 %v1159_v47 }
 0x4ad   :  { %1161 = vmatprep.subr.bf16.mxu1 %v1187_v18 }
 0x57e   :  { %v729_v42 = vpop.f32.mrb[8].mxu1 }
 0x57f   :  { %v734_v43 = vmul.f32 %v1182_v41, %v729_v42  ;;  %v1115_v44 = vpop.f32.mrb[9].mxu1 }
 0x581   :  { %1125 = vmatmul.mubr.msk.f32.vlgmr.msra.gmra.mrb[6].mxu0 %vm139_vm12, %v734_v43 }
 0x654   :  { %v815_v52 = vpop.f32.mrb[6].mxu0 }
 0x655   :  { %v816_v53 = vadd.f32 %v1022_v49, %v815_v52  ;;  %v1126_v54 = vpop.f32.mrb[7].mxu0 }
 0x657   :  { %v819_v56 = vmax.f32 %v816_v53, 0.0 }
 0x659   :  { %1132 = vmatmul.mubr.msk.f32.vlgmr.msra.gmra.mrb[10].mxu1 %vm189_vm4, %v819_v56 }
 0x65a   :  { %1163 = vmatpush3.bf16.msra.mxu1 %v1162_v55  ;;  %1138 = vmatprep.mubr.msk.f32.mxu1 %vm1185_vm1, %v1183_v0  ;;  %vm984_vm1 = vcmask 1024  }
 0x65d   :  { %1139 = vmatmul.mubr.msk.f32.vlgmr.msra.gmra.mrb[12].mxu1 %vm189_vm4, %v819_v56 }
 0x72c   :  { %v898_v58 = vpop.f32.mrb[10].mxu1 }
 0x72d   :  { %v1133_v59 = vpop.f32.mrb[11].mxu1  ;;  %v899_v3 = vadd.f32 %v1024_v61, %v898_v58 }
 0x730   :  { %v977_v62 = vpop.f32.mrb[12].mxu1 }
 0x731   :  { %v978_v1 = vadd.f32 %v1026_v60, %v977_v62  ;;  %v1140_v2 = vpop.f32.mrb[13].mxu1 }
 0x733   :  { %v982_v0 = vmul.f32 %v981_v63, %v978_v1 }
 0x735   :  { %v983_v4 = vsub.f32 %v982_v0, %v899_v3 }
 0x737   :  { %985 = vst.msk [vmem:[%s1444_s18] sm:$0x3] %vm984_vm1, %v983_v4 }

</bundles_post_ra>
